<compile_context>
chip_gen: v7x
topology: tpu7x:2x2x1
jax: 0.10.0
libtpu: 0.0.40
codegen_flags: <defaults>
</compile_context>

<pallas_src>
import math

import jax
import jax.numpy as jnp
from jax.experimental import pallas as pl
from jax.experimental.pallas import tpu as pltpu

NUM_INPUTS = 28
HIDDEN = 512
BN_EPS = 1e-5


def _round_up(n, m):
    return ((n + m - 1) // m) * m


def fraud_kernel(x_ref, w1_ref, pv_ref, b2_ref, out_ref):
    # ---- Linear(28 -> 512) on the MXU (bf16 operands, f32 accumulation) ----
    h = jnp.dot(x_ref[...], w1_ref[...],
                preferred_element_type=jnp.float32)          # [TILE_B, 512] f32
    h = h + pv_ref[0:1, :]                                   # + b1, broadcast [1, 512]

    # ---- Sigmoid: exp(-h) and approx reciprocal, both on the EUP slot ----
    t = jnp.exp(-h)
    s = pl.reciprocal(1.0 + t, approx=True)                  # f32

    # ---- BatchNorm folded into w2; Linear(512 -> 1) as VPU mul + XLU lane reduce ----
    out = jnp.sum(s * pv_ref[1:2, :], axis=-1, keepdims=True)  # [TILE_B, 1] f32
    out_ref[...] = out + b2_ref[0]                             # + folded b2 (SMEM scalar)


def fraud_model_forward(x, params, tile_b=1024):
    B, F = x.shape

    # --- Fold eval-mode BatchNorm (running stats) into the second linear. ---
    w2_col = params["w2"][:, 0]                                             # (512,)
    scale = params["bn_gamma"][0] / jnp.sqrt(params["bn_var"][0] + BN_EPS)  # (512,)
    w2_row = (w2_col * scale).reshape(1, HIDDEN).astype(jnp.float32)        # (1, 512)
    b2_f = (params["b2"].reshape(()) +
            jnp.sum((params["bn_beta"][0] - params["bn_mean"][0] * scale) * w2_col))
    b2_f = b2_f.reshape(1).astype(jnp.float32)                              # (1,) SMEM scalar

    # Pack the two resident [1, 512] row vectors into one operand.
    pv = jnp.concatenate([params["b1"].astype(jnp.float32), w2_row], axis=0)  # (2, 512)

    # --- Batch tiling (pad tail tile if B % TILE_B != 0). ---
    tile_b = min(tile_b, _round_up(B, 8))
    b_pad = _round_up(B, tile_b)
    x_p = x if b_pad == B else jnp.pad(x, ((0, b_pad - B), (0, 0)))
    num_tiles = b_pad // tile_b

    # bf16 MXU inputs (halve HBM stream / VMEM tiles; accumulation stays f32).
    x_bf = x_p.astype(jnp.bfloat16)
    w1_bf = params["w1"].astype(jnp.bfloat16)

    out = pl.pallas_call(
        fraud_kernel,
        out_shape=jax.ShapeDtypeStruct((b_pad, 1), jnp.float32),
        grid=(num_tiles,),
        in_specs=[
            pl.BlockSpec((tile_b, F), lambda i: (i, 0)),          # streamed x tiles
            pl.BlockSpec((F, HIDDEN), lambda i: (0, 0)),          # resident w1
            pl.BlockSpec((2, HIDDEN), lambda i: (0, 0)),          # resident [b1; w2_row]
            pl.BlockSpec(memory_space=pltpu.MemorySpace.SMEM),    # folded b2 scalar
        ],
        out_specs=pl.BlockSpec((tile_b, 1), lambda i: (i, 0)),
        compiler_params=pltpu.CompilerParams(
            dimension_semantics=("parallel",)),
    )(x_bf, w1_bf, pv, b2_f)

    return out[:B]


def init_params(key):
    """Deterministic init matching FraudModel._init_weights()."""
    k1, k2 = jax.random.split(key, 2)

    # Linear1: torch weight (512, 28), xavier_uniform -> stored transposed [28, 512].
    bound1 = math.sqrt(6.0 / (NUM_INPUTS + HIDDEN))
    w1 = jax.random.uniform(k1, (NUM_INPUTS, HIDDEN), jnp.float32,
                            minval=-bound1, maxval=bound1)
    b1 = jnp.full((1, HIDDEN), 0.1, jnp.float32)

    # BatchNorm1d(512): weight=1, bias=0.01, running_mean=0, running_var=1.
    bn_gamma = jnp.ones((1, HIDDEN), jnp.float32)
    bn_beta = jnp.full((1, HIDDEN), 0.01, jnp.float32)
    bn_mean = jnp.zeros((1, HIDDEN), jnp.float32)
    bn_var = jnp.ones((1, HIDDEN), jnp.float32)

    # Linear2: torch weight (1, 512), xavier_uniform -> stored transposed [512, 1].
    bound2 = math.sqrt(6.0 / (HIDDEN + 1))
    w2 = jax.random.uniform(k2, (HIDDEN, 1), jnp.float32,
                            minval=-bound2, maxval=bound2)
    b2 = jnp.full((1, 1), 0.1, jnp.float32)

    return {
        "w1": w1, "b1": b1,
        "bn_gamma": bn_gamma, "bn_beta": bn_beta,
        "bn_mean": bn_mean, "bn_var": bn_var,
        "w2": w2, "b2": b2,
    }


if __name__ == "__main__":
    key = jax.random.PRNGKey(0)
    pkey, xkey = jax.random.split(key)

    params = init_params(pkey)
    batch = 8
    x = jax.random.normal(xkey, (batch, NUM_INPUTS), jnp.float32)

    out = fraud_model_forward(x, params)
    jax.block_until_ready(out)

    assert out.shape == (batch, 1) and out.dtype == jnp.float32
    print("KERNEL_OK")
</pallas_src>

<mosaic_0001>
module attributes {stable_mosaic.version = 11 : i64} {
  func.func @fraud_kernel(%arg0: i32, %arg1: memref<8x28xbf16, #tpu.memory_space<vmem>>, %arg2: memref<28x512xbf16, #tpu.memory_space<vmem>>, %arg3: memref<2x512xf32, #tpu.memory_space<vmem>>, %arg4: memref<1xf32, #tpu.memory_space<smem>>, %arg5: memref<8x1xf32, #tpu.memory_space<vmem>>) attributes {dimension_semantics = [#tpu.dimension_semantics<parallel>], iteration_bounds = array<i64: 1>, scalar_prefetch = 0 : i64, scratch_operands = 0 : i64, tpu.core_type = #tpu.core_type<tc>, window_params = [{transform_indices = @transform_0, window_bounds = array<i64: 8, 28>}, {pipeline_mode = #tpu.pipeline_mode<synchronous>, transform_indices = @transform_1, window_bounds = array<i64: 28, 512>}, {pipeline_mode = #tpu.pipeline_mode<synchronous>, transform_indices = @transform_2, window_bounds = array<i64: 2, 512>}, {transform_indices = @transform_3, window_bounds = array<i64: 1>}, {transform_indices = @transform_4, window_bounds = array<i64: 8, 1>}]} {
    %c0 = arith.constant 0 : index
    %c0_0 = arith.constant 0 : index
    %0 = vector.load %arg1[%c0, %c0_0] : memref<8x28xbf16, #tpu.memory_space<vmem>>, vector<8x28xbf16>
    %c0_1 = arith.constant 0 : index
    %c0_2 = arith.constant 0 : index
    %1 = vector.load %arg2[%c0_1, %c0_2] : memref<28x512xbf16, #tpu.memory_space<vmem>>, vector<28x512xbf16>
    %cst = arith.constant dense<0.000000e+00> : vector<8x512xf32>
    %2 = tpu.matmul %0, %1, %cst {dimension_numbers = #tpu.dot_dimension_numbers<[1], [0], [0], [1], [0, 0, 1, 1], [], []>} : vector<8x28xbf16>, vector<28x512xbf16>, vector<8x512xf32> -> vector<8x512xf32>
    %c0_3 = arith.constant 0 : index
    %c0_4 = arith.constant 0 : index
    %3 = vector.load %arg3[%c0_3, %c0_4] : memref<2x512xf32, #tpu.memory_space<vmem>>, vector<1x512xf32>
    %4 = vector.broadcast %3 : vector<1x512xf32> to vector<8x512xf32>
    %5 = arith.addf %2, %4 : vector<8x512xf32>
    %cst_5 = arith.constant 0.000000e+00 : f32
    %6 = vector.broadcast %cst_5 : f32 to vector<8x512xf32>
    %7 = arith.subf %6, %5 : vector<8x512xf32>
    %8 = math.exp %7 : vector<8x512xf32>
    %cst_6 = arith.constant 1.000000e+00 : f32
    %9 = vector.broadcast %cst_6 : f32 to vector<8x512xf32>
    %10 = arith.addf %9, %8 : vector<8x512xf32>
    %11 = tpu.reciprocal %10 {approx = true} : vector<8x512xf32> -> vector<8x512xf32>
    %c1 = arith.constant 1 : index
    %c0_7 = arith.constant 0 : index
    %12 = vector.load %arg3[%c1, %c0_7] : memref<2x512xf32, #tpu.memory_space<vmem>>, vector<1x512xf32>
    %13 = vector.broadcast %12 : vector<1x512xf32> to vector<8x512xf32>
    %14 = arith.mulf %11, %13 : vector<8x512xf32>
    %cst_8 = arith.constant dense<0.000000e+00> : vector<8xf32>
    %15 = vector.multi_reduction <add>, %14, %cst_8 [1] : vector<8x512xf32> to vector<8xf32>
    %16 = vector.shape_cast %15 : vector<8xf32> to vector<8x1xf32>
    %c0_9 = arith.constant 0 : index
    %17 = memref.load %arg4[%c0_9] : memref<1xf32, #tpu.memory_space<smem>>
    %18 = vector.broadcast %17 : f32 to vector<8x1xf32>
    %19 = arith.addf %16, %18 : vector<8x1xf32>
    %c0_10 = arith.constant 0 : index
    %c0_11 = arith.constant 0 : index
    %20 = vector.load %arg5[%c0_10, %c0_11] : memref<8x1xf32, #tpu.memory_space<vmem>>, vector<8x1xf32>
    tpu.vector_store %arg5[%c0_10, %c0_11], %19 {strides = array<i32>} : memref<8x1xf32, #tpu.memory_space<vmem>>, vector<8x1xf32>,
    return
  }
  func.func @transform_0(%arg0: i32) -> (i32, i32) {
    %c0_i32 = arith.constant 0 : i32
    %c0_i32_0 = arith.constant 0 : i32
    return %arg0, %c0_i32 : i32, i32
  }
  func.func @transform_1(%arg0: i32) -> (i32, i32) {
    %c0_i32 = arith.constant 0 : i32
    %c0_i32_0 = arith.constant 0 : i32
    %c0_i32_1 = arith.constant 0 : i32
    return %c0_i32, %c0_i32_0 : i32, i32
  }
  func.func @transform_2(%arg0: i32) -> (i32, i32) {
    %c0_i32 = arith.constant 0 : i32
    %c0_i32_0 = arith.constant 0 : i32
    %c0_i32_1 = arith.constant 0 : i32
    return %c0_i32, %c0_i32_0 : i32, i32
  }
  func.func @transform_3(%arg0: i32) -> i32 {
    %c0_i32 = arith.constant 0 : i32
    %c0_i32_0 = arith.constant 0 : i32
    return %c0_i32 : i32
  }
  func.func @transform_4(%arg0: i32) -> (i32, i32) {
    %c0_i32 = arith.constant 0 : i32
    %c0_i32_0 = arith.constant 0 : i32
    return %arg0, %c0_i32 : i32, i32
  }
}

</mosaic_0001>

<bundles_post_ra>
// kernel: tpu_custom_call.1
= control target key start
LH: loop header
LB: loop body
LE: loop exit
PB: predicated region body
PF: predicated region fallthrough
CT: control target
= control target key end

     0   :  { %10 = vsyncpa [#allocation4], 0  ;;  %s441_s0 = inlined_call_operand.hbm [shape: bf16[8,28], index: 0, kind: input, shape index: {}]   ;;  %s442_s1 = inlined_call_operand.hbm [shape: bf16[28,512], index: 1, kind: input, shape index: {}]   ;;  %s443_s2 = inlined_call_operand.vmem [shape: f32[2,512], index: 2, kind: input, shape index: {}]   ;;  %s444_s3 = inlined_call_operand.<no memory space> [shape: f32[1], index: 3, kind: input, shape index: {}]   ;;  %s445_s4 = inlined_call_operand.vmem [shape: f32[8,1], index: 4, kind: output, shape index: {}]  }
   0x1   :  { %11 = vsyncpa [#allocation6], 0  ;;  %s368_s15 = smov [#allocation3]   ;;  %s369_s17 = smov [#allocation5]  }
   0x2   :  { %s18_s16 = sshll.u32 %s368_s15, 4  ;;  %s27_s18 = sshll.u32 %s369_s17, 4  ;;  %s19_s16 = int_to_ptr.vmem [resolvable:$true] %s18_s16  ;;  %s398_s18 = int_to_ptr.vmem [resolvable:$true] %s27_s18 }
   0x3   :  { %s320_s21 = scalar_lea.hbm %s441_s0, 64 }
   0x4   :  { %p321_p0 = scmp.ne.s32.totalorder %s441_s0, %s320_s21  ;;  %p324_p1 = scmp.lt.u32.totalorder %s320_s21, %s441_s0 }
   0x6   :  { %p326_p2 = pnand %p324_p1, %p321_p0 }
   0x8   :  { %329 = shalt.err (!%p326_p2)
}
   0x9   :  { %s330_s26 = scalar_lea.vmem %s19_s16, 64  ;;  %p335_p4 = scmp.lt.s32.totalorder %s19_s16, %s19_s16 }
   0xa   :  { %p331_p3 = scmp.ne.s32.totalorder %s19_s16, %s330_s26  ;;  %p336_p5 = scmp.lt.s32.totalorder %s330_s26, %s330_s26 }
   0xc   :  { %p337_p6 = por %p336_p5, %p335_p4 }
   0xe   :  { %p338_p7 = pnand %p337_p6, %p331_p3 }
  0x10   :  { %341 = shalt.err (!%p338_p7)
}
  0x11   :  { %21 = dma.hbm_to_vmem [thread:$0]  %s441_s0, 64, %s19_s16, [#allocation4]  }
  0x12   :  { %s342_s5 = scalar_lea.hbm %s442_s1, 1024 }
  0x13   :  { %p343_p8 = scmp.ne.s32.totalorder %s442_s1, %s342_s5  ;;  %p346_p9 = scmp.lt.u32.totalorder %s342_s5, %s442_s1 }
  0x15   :  { %p348_p10 = pnand %p346_p9, %p343_p8 }
  0x17   :  { %351 = shalt.err (!%p348_p10)
}
  0x18   :  { %s352_s10 = scalar_lea.vmem %s398_s18, 1024  ;;  %p357_p12 = scmp.lt.s32.totalorder %s398_s18, %s398_s18 }
  0x19   :  { %p353_p11 = scmp.ne.s32.totalorder %s398_s18, %s352_s10  ;;  %p358_p13 = scmp.lt.s32.totalorder %s352_s10, %s352_s10 }
  0x1b   :  { %p359_p0 = por %p358_p13, %p357_p12 }
  0x1d   :  { %p360_p1 = pnand %p359_p0, %p353_p11 }
  0x1f   :  { %363 = shalt.err (!%p360_p1)
}
  0x20   :  { %s370_s0 = smov 256   ;;  %s371_s11 = smov 16  }
  0x21   :  { %33 = dma.hbm_to_vmem [thread:$0]  %s442_s1, 1024, %s398_s18, [#allocation6], %s370_s0, %s370_s0, %s371_s11  }
  0x22   :  { %364 = dma.done.wait [#allocation4], 64  }
  0x23   :  { %365 = vsyncadd [#allocation4], 4294967232 }
  0x24   :  { %366 = dma.done.wait [#allocation6], 1024  }
  0x25   :  { %367 = vsyncadd [#allocation6], 4294966272  ;;  %v372_v0 = vmov 0   ;;  %v292_v1 = vld [vmem:[#allocation5 + $0x4] ss:$16 sps:$4 sm:$0xff]   ;;  %vm116_vm0 = vcmask 1045504   ;;  %v56_v12 = vlaneseq }
  0x26   :  { %161 = vmatprep.mubr.bf16.mxu0 %v372_v0  ;;  %202 = vmatprep.mubr.bf16.mxu1 %v372_v0  ;;  %v294_v2 = vld [vmem:[#allocation5 + $0xc] ss:$16 sps:$4 sm:$0xff]   ;;  %v296_v3 = vld [vmem:[#allocation5] ss:$16 sps:$4 sm:$0xff]   ;;  %v297_v4 = vld [vmem:[#allocation5 + $0x8] ss:$16 sps:$4 sm:$0xff]  }
  0x27   :  { %129 = vmatprep.subr.bf16.mxu0 %v292_v1  ;;  %170 = vmatprep.subr.bf16.mxu1 %v294_v2  ;;  %v298_v5 = vld [vmem:[#allocation5 + $0x24] ss:$16 sps:$4 sm:$0x3f]   ;;  %v300_v6 = vld [vmem:[#allocation5 + $0x2c] ss:$16 sps:$4 sm:$0x3f]  }
  0x28   :  { %130 = vmatpush1.bf16.msra.mxu0 %v296_v3  ;;  %171 = vmatpush1.bf16.msra.mxu1 %v297_v4  ;;  %v302_v7 = vld [vmem:[#allocation5 + $0x20] ss:$16 sps:$4 sm:$0x3f]   ;;  %v303_v8 = vld [vmem:[#allocation5 + $0x28] ss:$16 sps:$4 sm:$0x3f]   ;;  %v264_v3 = vstv %s444_s3 }
  0x29   :  { %282 = vmatprep.subr.msk.bf16.mxu0 %vm116_vm0, %v298_v5  ;;  %284 = vmatprep.subr.msk.bf16.mxu1 %vm116_vm0, %v300_v6  ;;  %v118_v9 = vsel %vm116_vm0, %v302_v7, 0  ;;  %v124_v10 = vsel %vm116_vm0, %v303_v8, 0  ;;  %v45_v11 = vld [vmem:[#allocation3] sm:$0xf]  ;;  %vm112_vm1 = vcmask 228352   ;;  %v57_v13 = vshrl.u32 %v56_v12, 7 }
  0x2a   :  { %v54_v16 = vld [vmem:[%s443_s2] ss:$2 sm:$0xf]  ;;  %v286_v51 = vld [vmem:[%s443_s2 + $0x1] ss:$2 sm:$0xf] }
  0x2b   :  { %v58_v14 = vsub.s32 0, %v57_v13  ;;  %v66_v15 = vsub.s32 2, %v57_v13  ;;  %v62_v17 = vsub.s32 1, %v57_v13  ;;  %v70_v18 = vsub.s32 3, %v57_v13 }
  0x2c   :  { %132 = vmatpush1.bf16.msra.mxu0 %v118_v9  ;;  %173 = vmatpush1.bf16.msra.mxu1 %v124_v10  ;;  %vm266_vm2 = vcmask 7168  }
  0x2d   :  { %v59_v19 = vrot.slane %v54_v16, %v58_v14  ;;  %v67_v20 = vrot.slane %v54_v16, %v66_v15  ;;  %v63_v21 = vrot.slane %v54_v16, %v62_v17  ;;  %v71_v22 = vrot.slane %v54_v16, %v70_v18 }
  0x2e   :  { %v237_v52 = vrot.slane %v286_v51, %v58_v14  ;;  %v241_v53 = vrot.slane %v286_v51, %v62_v17  ;;  %v245_v54 = vrot.slane %v286_v51, %v66_v15  ;;  %v249_v59 = vrot.slane %v286_v51, %v70_v18 }
  0x2f   :  { %283 = vmatmul.mubr.msk.bf16.vlgmr.msra.gmra.mrb[0].mxu0 %vm112_vm1, %v45_v11  ;;  %285 = vmatmul.mubr.msk.bf16.vlgmr.msra.gmra.mrb[0].mxu1 %vm112_vm1, %v45_v11 }
 0x102   :  { %v163_v23 = vpop.f32.mrb[0].mxu0  ;;  %v204_v24 = vpop.f32.mrb[0].mxu1 }
 0x103   :  { %v164_v25 = vadd.f32 %v163_v23, %v59_v19  ;;  %v205_v26 = vadd.f32 %v204_v24, %v67_v20  ;;  %v165_v27 = vpop.f32.mrb[1].mxu0  ;;  %v206_v28 = vpop.f32.mrb[1].mxu1 }
 0x104   :  { %v166_v29 = vadd.f32 %v165_v27, %v63_v21  ;;  %v207_v30 = vadd.f32 %v206_v28, %v71_v22  ;;  %v167_v31 = vpop.f32.mrb[2].mxu0  ;;  %v208_v32 = vpop.f32.mrb[2].mxu1 }
 0x105   :  { %v211_v33 = vsub.f32 0.0, %v164_v25  ;;  %v213_v34 = vsub.f32 0.0, %v205_v26  ;;  %v168_v35 = vpop.f32.mrb[3].mxu0  ;;  %v209_v36 = vpop.f32.mrb[3].mxu1 }
 0x106   :  { %v212_v37 = vsub.f32 0.0, %v166_v29  ;;  %v214_v38 = vsub.f32 0.0, %v207_v30 }
 0x107   :  { %v215_v39 = vmul.f32 1.442695, %v211_v33  ;;  %v219_v40 = vmul.f32 1.442695, %v213_v34 }
 0x108   :  { %v217_v41 = vmul.f32 1.442695, %v212_v37  ;;  %v221_v42 = vmul.f32 1.442695, %v214_v38 }
 0x109   :  { %304 = vpow2.f32 %v215_v39 }
 0x10a   :  { %306 = vpow2.f32 %v219_v40 }
 0x10b   :  { %308 = vpow2.f32 %v217_v41 }
 0x10c   :  { %310 = vpow2.f32 %v221_v42 }
 0x113   :  { %v305_v43 = vpop.eup %304 }
 0x114   :  { %v307_v44 = vpop.eup %306  ;;  %v223_v45 = vadd.f32 1.0, %v305_v43 }
 0x115   :  { %v309_v46 = vpop.eup %308  ;;  %v225_v47 = vadd.f32 1.0, %v307_v44 }
 0x116   :  { %v311_v48 = vpop.eup %310  ;;  %312 = vrcp.f32 %v223_v45  ;;  %v224_v49 = vadd.f32 1.0, %v309_v46 }
 0x117   :  { %314 = vrcp.f32 %v225_v47  ;;  %v226_v50 = vadd.f32 1.0, %v311_v48 }
 0x118   :  { %316 = vrcp.f32 %v224_v49 }
 0x119   :  { %318 = vrcp.f32 %v226_v50 }
 0x120   :  { %v313_v55 = vpop.eup %312 }
 0x121   :  { %v315_v56 = vpop.eup %314  ;;  %v254_v57 = vmul.f32 %v313_v55, %v237_v52 }
 0x122   :  { %v317_v58 = vpop.eup %316  ;;  %v256_v61 = vmul.f32 %v315_v56, %v245_v54 }
 0x123   :  { %v255_v60 = vmul.f32 %v317_v58, %v241_v53  ;;  %v319_v62 = vpop.eup %318 }
 0x124   :  { %v257_v0 = vmul.f32 %v319_v62, %v249_v59 }
 0x125   :  { %v258_v63 = vadd.f32 %v255_v60, %v254_v57 }
 0x127   :  { %v259_v1 = vadd.f32 %v258_v63, %v256_v61 }
 0x129   :  { %v260_v2 = vadd.f32 %v259_v1, %v257_v0 }
 0x12b   :  { %261 = vadd.xlane.f32.xlu0 %v260_v2 }
 0x1b8   :  { %v262_v4 = vpop.xlane.xlu0 %261 }
 0x1b9   :  { %v265_v5 = vadd.f32 %v264_v3, %v262_v4 }
 0x1bb   :  { %267 = vst.msk [vmem:[%s445_s4] sm:$0xff] %vm266_vm2, %v265_v5 }
 0x1bc   :  { %272 = vsyncpa [#allocation4], 1 }
 0x1bd   :  { %273 = vsyncpa [#allocation6], 1 }

</bundles_post_ra>
